<compile_context>
chip_gen: v5e
topology: v5e:2x2
jax: 0.10.0
libtpu: 0.0.40
codegen_flags: <defaults>
</compile_context>

<pallas_src>
import functools

import jax
import jax.numpy as jnp
from jax.experimental import pallas as pl
from jax.experimental.pallas import tpu as pltpu


def _round_up(x, m):
    return (x + m - 1) // m * m


# ----------------------------- Pallas kernels -----------------------------

def _convbn_kernel(p_ref, w_ref, b_ref, o_ref, *, apply_relu):
    # conv tile (as matmul, BN scale pre-folded into w) + bias (+ ReLU).
    y = jnp.dot(p_ref[...], w_ref[...], preferred_element_type=jnp.float32)
    y = y + b_ref[...]
    if apply_relu:
        y = jnp.maximum(y, 0.0)
    o_ref[...] = y.astype(o_ref.dtype)


def _convbn_add_relu_kernel(p_ref, w_ref, b_ref, r_ref, o_ref):
    # conv tile + bias + residual add + ReLU (single lane-dense store).
    y = jnp.dot(p_ref[...], w_ref[...], preferred_element_type=jnp.float32)
    y = y + b_ref[...] + r_ref[...]
    o_ref[...] = jnp.maximum(y, 0.0).astype(o_ref.dtype)


def _fused_conv_bn(patches, w2d, scale, bias, *, apply_relu, residual=None,
                   compute_dtype=jnp.float32, tm=512):
    """patches: (M, K); w2d: (K, Cout); scale/bias: (1, Cout); residual: (M, Cout)|None.

    compute_dtype=jnp.bfloat16 unlocks v6e/v7x MXU peak (f32 accumulate kept),
    but f32 is the default to hold the 1e-4 reference tolerance.
    """
    M, K = patches.shape
    Cout = w2d.shape[1]

    # Fold the BN scale into the weight columns -> epilogue is bias-add only.
    w_scaled = w2d * scale                                   # (K, Cout)

    # Hardware-friendly padding: Cout -> mult of 128 (lane-dense output),
    # K -> mult of 8 (f32 sublane), M -> mult of TM (clean grid, no partials).
    Kp = _round_up(K, 8)
    Cp = _round_up(Cout, 128)
    TM = min(tm, _round_up(M, 8))
    Mp = _round_up(M, TM)

    p = jnp.pad(patches, ((0, Mp - M), (0, Kp - K))).astype(compute_dtype)
    w = jnp.pad(w_scaled, ((0, Kp - K), (0, Cp - Cout))).astype(compute_dtype)
    b = jnp.pad(bias, ((0, 0), (0, Cp - Cout))).astype(jnp.float32)

    in_specs = [
        pl.BlockSpec((TM, Kp), lambda i: (i, 0)),            # streamed patches
        pl.BlockSpec((Kp, Cp), lambda i: (0, 0)),            # resident weight
        pl.BlockSpec((1, Cp), lambda i: (0, 0)),             # resident bias
    ]
    args = [p, w, b]
    if residual is None:
        kernel = functools.partial(_convbn_kernel, apply_relu=apply_relu)
    else:
        r = jnp.pad(residual, ((0, Mp - M), (0, Cp - Cout))).astype(jnp.float32)
        in_specs.append(pl.BlockSpec((TM, Cp), lambda i: (i, 0)))  # streamed res
        args.append(r)
        kernel = _convbn_add_relu_kernel

    # VMEM budget: resident weight + bias, plus double-buffered streaming tiles
    # (patches, optional residual, output), with some headroom. Cap at 64 MiB
    # (v7x physical limit).
    isz = jnp.dtype(compute_dtype).itemsize
    est = (Kp * Cp * isz + Cp * 4
           + 2 * TM * Kp * isz
           + 2 * TM * Cp * 4 * (2 if residual is not None else 1)
           + (2 << 20))
    vmem_bytes = int(min(max(est, 16 << 20), 64 << 20))

    out = pl.pallas_call(
        kernel,
        out_shape=jax.ShapeDtypeStruct((Mp, Cp), jnp.float32),
        grid=(Mp // TM,),
        in_specs=in_specs,
        out_specs=pl.BlockSpec((TM, Cp), lambda i: (i, 0)),
        compiler_params=pltpu.CompilerParams(
            dimension_semantics=("parallel",),
            vmem_limit_bytes=vmem_bytes),
    )(*args)
    return out[:M, :Cout]


# ------------------------------- JAX glue ----------------------------------

def _im2col(x_nhwc, kh, kw, stride, pad):
    """Extract conv patches; returns ((N*Ho*Wo, kh*kw*C), Ho, Wo).

    Column ordering is [kh, kw, cin] to match the weight reshape below.
    """
    N, H, W, C = x_nhwc.shape
    xp = jnp.pad(x_nhwc, ((0, 0), (pad, pad), (pad, pad), (0, 0)))
    Ho = (H + 2 * pad - kh) // stride + 1
    Wo = (W + 2 * pad - kw) // stride + 1
    cols = []
    for i in range(kh):
        for j in range(kw):
            cols.append(xp[:, i:i + stride * Ho:stride, j:j + stride * Wo:stride, :])
    patches = jnp.concatenate(cols, axis=-1)          # (N, Ho, Wo, kh*kw*C)
    return patches.reshape(N * Ho * Wo, kh * kw * C), Ho, Wo


def _weight_to_2d(w_oihw):
    """(Cout, Cin, KH, KW) -> (KH*KW*Cin, Cout), matching _im2col ordering."""
    Cout, Cin, KH, KW = w_oihw.shape
    return jnp.transpose(w_oihw, (2, 3, 1, 0)).reshape(KH * KW * Cin, Cout)


def _fold_bn(gamma, beta, mean, var, eps=1e-5):
    scale = gamma / jnp.sqrt(var + eps)
    bias = beta - mean * scale
    return scale.reshape(1, -1), bias.reshape(1, -1)


def basic_block_forward(x_nchw, params, stride):
    """Forward pass of BasicBlock. x_nchw: (N, Cin, H, W) float32."""
    N, Cin, H, W = x_nchw.shape
    x = jnp.transpose(x_nchw, (0, 2, 3, 1))           # NHWC

    planes = params["w1"].shape[0]
    has_shortcut = (stride != 1) or (Cin != planes)

    # conv1 (3x3, stride s, pad 1) + bn1 + relu
    p1, Ho, Wo = _im2col(x, 3, 3, stride, 1)
    s1, b1 = _fold_bn(params["bn1_g"], params["bn1_b"],
                      params["bn1_m"], params["bn1_v"])
    out1 = _fused_conv_bn(p1, _weight_to_2d(params["w1"]), s1, b1,
                          apply_relu=True)            # (N*Ho*Wo, planes)

    # shortcut branch
    if has_shortcut:
        # 1x1 conv stride s pad 0: Ho_s = (H-1)//s + 1 == ceil(H/s), identical
        # to the strided slice below for all H, W.
        ps = x[:, ::stride, ::stride, :].reshape(N * Ho * Wo, Cin)
        ss, bs = _fold_bn(params["bns_g"], params["bns_b"],
                          params["bns_m"], params["bns_v"])
        shortcut = _fused_conv_bn(ps, _weight_to_2d(params["ws"]), ss, bs,
                                  apply_relu=False)   # (N*Ho*Wo, planes)
    else:
        shortcut = x.reshape(N * Ho * Wo, Cin)

    # conv2 (3x3, stride 1, pad 1) + bn2 + residual add + relu (fused epilogue)
    out1_nhwc = out1.reshape(N, Ho, Wo, planes)
    p2, _, _ = _im2col(out1_nhwc, 3, 3, 1, 1)
    s2, b2 = _fold_bn(params["bn2_g"], params["bn2_b"],
                      params["bn2_m"], params["bn2_v"])
    out = _fused_conv_bn(p2, _weight_to_2d(params["w2"]), s2, b2,
                         apply_relu=True, residual=shortcut)

    out = out.reshape(N, Ho, Wo, planes)
    return jnp.transpose(out, (0, 3, 1, 2))           # back to NCHW


# ------------------------- deterministic parameters -------------------------

def init_params(key, in_planes, planes):
    ks = jax.random.split(key, 12)
    f32 = jnp.float32
    p = {
        "w1": 0.1 * jax.random.normal(ks[0], (planes, in_planes, 3, 3), f32),
        "w2": 0.1 * jax.random.normal(ks[1], (planes, planes, 3, 3), f32),
        "bn1_g": 1.0 + 0.1 * jax.random.normal(ks[2], (planes,), f32),
        "bn1_b": 0.1 * jax.random.normal(ks[3], (planes,), f32),
        "bn1_m": 0.1 * jax.random.normal(ks[4], (planes,), f32),
        "bn1_v": 1.0 + 0.1 * jnp.abs(jax.random.normal(ks[5], (planes,), f32)),
        "bn2_g": 1.0 + 0.1 * jax.random.normal(ks[6], (planes,), f32),
        "bn2_b": 0.1 * jax.random.normal(ks[7], (planes,), f32),
        "bn2_m": 0.1 * jax.random.normal(ks[8], (planes,), f32),
        "bn2_v": 1.0 + 0.1 * jnp.abs(jax.random.normal(ks[9], (planes,), f32)),
        # shortcut 1x1 conv + bn (used because stride!=1 / in_planes!=planes)
        "ws": 0.1 * jax.random.normal(ks[10], (planes, in_planes, 1, 1), f32),
        "bns_g": jnp.ones((planes,), f32),
        "bns_b": jnp.zeros((planes,), f32),
        "bns_m": jnp.zeros((planes,), f32),
        "bns_v": jnp.ones((planes,), f32),
    }
    return p


# --------------------------- pure-JAX reference -----------------------------

def _ref_conv(x_nchw, w, stride, pad):
    return jax.lax.conv_general_dilated(
        x_nchw, w, window_strides=(stride, stride),
        padding=[(pad, pad), (pad, pad)],
        dimension_numbers=("NCHW", "OIHW", "NCHW"))


def _ref_bn(x, g, b, m, v, eps=1e-5):
    g, b, m, v = (a.reshape(1, -1, 1, 1) for a in (g, b, m, v))
    return g * (x - m) / jnp.sqrt(v + eps) + b


def basic_block_ref(x, p, stride):
    out = jax.nn.relu(_ref_bn(_ref_conv(x, p["w1"], stride, 1),
                              p["bn1_g"], p["bn1_b"], p["bn1_m"], p["bn1_v"]))
    out = _ref_bn(_ref_conv(out, p["w2"], 1, 1),
                  p["bn2_g"], p["bn2_b"], p["bn2_m"], p["bn2_v"])
    sc = _ref_bn(_ref_conv(x, p["ws"], stride, 0),
                 p["bns_g"], p["bns_b"], p["bns_m"], p["bns_v"])
    return jax.nn.relu(out + sc)


# ---------------------------------- main ------------------------------------

if __name__ == "__main__":
    key = jax.random.PRNGKey(0)
    kx, kp = jax.random.split(key)

    N, in_planes, H, W = 2, 4, 16, 16
    planes, stride = 8, 2           # stride != 1 -> shortcut conv path exercised

    x = jax.random.normal(kx, (N, in_planes, H, W), jnp.float32)
    params = init_params(kp, in_planes, planes)

    fwd = jax.jit(basic_block_forward, static_argnums=2)
    out = jax.block_until_ready(fwd(x, params, stride))

    ref = jax.block_until_ready(basic_block_ref(x, params, stride))
    assert out.shape == (N, planes, H // stride, W // stride), out.shape
    assert jnp.allclose(out, ref, atol=1e-4, rtol=1e-4), float(
        jnp.max(jnp.abs(out - ref)))

    print("KERNEL_OK")
</pallas_src>

<mosaic_0001>
module attributes {stable_mosaic.version = 11 : i64} {
  func.func @_convbn_kernel(%arg0: i32, %arg1: memref<128x8xf32, #tpu.memory_space<vmem>>, %arg2: memref<8x128xf32, #tpu.memory_space<vmem>>, %arg3: memref<1x128xf32, #tpu.memory_space<vmem>>, %arg4: memref<128x128xf32, #tpu.memory_space<vmem>>) attributes {dimension_semantics = [#tpu.dimension_semantics<parallel>], iteration_bounds = array<i64: 1>, scalar_prefetch = 0 : i64, scratch_operands = 0 : i64, tpu.core_type = #tpu.core_type<tc>, window_params = [{transform_indices = @transform_0, window_bounds = array<i64: 128, 8>}, {pipeline_mode = #tpu.pipeline_mode<synchronous>, transform_indices = @transform_1, window_bounds = array<i64: 8, 128>}, {pipeline_mode = #tpu.pipeline_mode<synchronous>, transform_indices = @transform_2, window_bounds = array<i64: 1, 128>}, {transform_indices = @transform_3, window_bounds = array<i64: 128, 128>}]} {
    %c0 = arith.constant 0 : index
    %c0_0 = arith.constant 0 : index
    %0 = vector.load %arg1[%c0, %c0_0] : memref<128x8xf32, #tpu.memory_space<vmem>>, vector<128x8xf32>
    %c0_1 = arith.constant 0 : index
    %c0_2 = arith.constant 0 : index
    %1 = vector.load %arg2[%c0_1, %c0_2] : memref<8x128xf32, #tpu.memory_space<vmem>>, vector<8x128xf32>
    %cst = arith.constant dense<0.000000e+00> : vector<128x128xf32>
    %2 = tpu.matmul %0, %1, %cst {dimension_numbers = #tpu.dot_dimension_numbers<[1], [0], [0], [1], [0, 0, 1, 1], [], []>} : vector<128x8xf32>, vector<8x128xf32>, vector<128x128xf32> -> vector<128x128xf32>
    %c0_3 = arith.constant 0 : index
    %c0_4 = arith.constant 0 : index
    %3 = vector.load %arg3[%c0_3, %c0_4] : memref<1x128xf32, #tpu.memory_space<vmem>>, vector<1x128xf32>
    %4 = vector.broadcast %3 : vector<1x128xf32> to vector<128x128xf32>
    %5 = arith.addf %2, %4 : vector<128x128xf32>
    %c0_5 = arith.constant 0 : index
    %c0_6 = arith.constant 0 : index
    %6 = vector.load %arg4[%c0_5, %c0_6] : memref<128x128xf32, #tpu.memory_space<vmem>>, vector<128x128xf32>
    tpu.vector_store %arg4[%c0_5, %c0_6], %5 {strides = array<i32>} : memref<128x128xf32, #tpu.memory_space<vmem>>, vector<128x128xf32>,
    return
  }
  func.func @transform_0(%arg0: i32) -> (i32, i32) {
    %c0_i32 = arith.constant 0 : i32
    %c0_i32_0 = arith.constant 0 : i32
    return %arg0, %c0_i32 : i32, i32
  }
  func.func @transform_1(%arg0: i32) -> (i32, i32) {
    %c0_i32 = arith.constant 0 : i32
    %c0_i32_0 = arith.constant 0 : i32
    %c0_i32_1 = arith.constant 0 : i32
    return %c0_i32, %c0_i32_0 : i32, i32
  }
  func.func @transform_2(%arg0: i32) -> (i32, i32) {
    %c0_i32 = arith.constant 0 : i32
    %c0_i32_0 = arith.constant 0 : i32
    %c0_i32_1 = arith.constant 0 : i32
    return %c0_i32, %c0_i32_0 : i32, i32
  }
  func.func @transform_3(%arg0: i32) -> (i32, i32) {
    %c0_i32 = arith.constant 0 : i32
    %c0_i32_0 = arith.constant 0 : i32
    return %arg0, %c0_i32 : i32, i32
  }
}

module attributes {stable_mosaic.version = 11 : i64} {
  func.func @_convbn_kernel(%arg0: i32, %arg1: memref<128x40xf32, #tpu.memory_space<vmem>>, %arg2: memref<40x128xf32, #tpu.memory_space<vmem>>, %arg3: memref<1x128xf32, #tpu.memory_space<vmem>>, %arg4: memref<128x128xf32, #tpu.memory_space<vmem>>) attributes {dimension_semantics = [#tpu.dimension_semantics<parallel>], iteration_bounds = array<i64: 1>, scalar_prefetch = 0 : i64, scratch_operands = 0 : i64, tpu.core_type = #tpu.core_type<tc>, window_params = [{transform_indices = @transform_0, window_bounds = array<i64: 128, 40>}, {pipeline_mode = #tpu.pipeline_mode<synchronous>, transform_indices = @transform_1, window_bounds = array<i64: 40, 128>}, {pipeline_mode = #tpu.pipeline_mode<synchronous>, transform_indices = @transform_2, window_bounds = array<i64: 1, 128>}, {transform_indices = @transform_3, window_bounds = array<i64: 128, 128>}]} {
    %c0 = arith.constant 0 : index
    %c0_0 = arith.constant 0 : index
    %0 = vector.load %arg1[%c0, %c0_0] : memref<128x40xf32, #tpu.memory_space<vmem>>, vector<128x40xf32>
    %c0_1 = arith.constant 0 : index
    %c0_2 = arith.constant 0 : index
    %1 = vector.load %arg2[%c0_1, %c0_2] : memref<40x128xf32, #tpu.memory_space<vmem>>, vector<40x128xf32>
    %cst = arith.constant dense<0.000000e+00> : vector<128x128xf32>
    %2 = tpu.matmul %0, %1, %cst {dimension_numbers = #tpu.dot_dimension_numbers<[1], [0], [0], [1], [0, 0, 1, 1], [], []>} : vector<128x40xf32>, vector<40x128xf32>, vector<128x128xf32> -> vector<128x128xf32>
    %c0_3 = arith.constant 0 : index
    %c0_4 = arith.constant 0 : index
    %3 = vector.load %arg3[%c0_3, %c0_4] : memref<1x128xf32, #tpu.memory_space<vmem>>, vector<1x128xf32>
    %4 = vector.broadcast %3 : vector<1x128xf32> to vector<128x128xf32>
    %5 = arith.addf %2, %4 : vector<128x128xf32>
    %cst_5 = arith.constant 0.000000e+00 : f32
    %6 = vector.broadcast %cst_5 : f32 to vector<128x128xf32>
    %7 = arith.maximumf %5, %6 : vector<128x128xf32>
    %c0_6 = arith.constant 0 : index
    %c0_7 = arith.constant 0 : index
    %8 = vector.load %arg4[%c0_6, %c0_7] : memref<128x128xf32, #tpu.memory_space<vmem>>, vector<128x128xf32>
    tpu.vector_store %arg4[%c0_6, %c0_7], %7 {strides = array<i32>} : memref<128x128xf32, #tpu.memory_space<vmem>>, vector<128x128xf32>,
    return
  }
  func.func @transform_0(%arg0: i32) -> (i32, i32) {
    %c0_i32 = arith.constant 0 : i32
    %c0_i32_0 = arith.constant 0 : i32
    return %arg0, %c0_i32 : i32, i32
  }
  func.func @transform_1(%arg0: i32) -> (i32, i32) {
    %c0_i32 = arith.constant 0 : i32
    %c0_i32_0 = arith.constant 0 : i32
    %c0_i32_1 = arith.constant 0 : i32
    return %c0_i32, %c0_i32_0 : i32, i32
  }
  func.func @transform_2(%arg0: i32) -> (i32, i32) {
    %c0_i32 = arith.constant 0 : i32
    %c0_i32_0 = arith.constant 0 : i32
    %c0_i32_1 = arith.constant 0 : i32
    return %c0_i32, %c0_i32_0 : i32, i32
  }
  func.func @transform_3(%arg0: i32) -> (i32, i32) {
    %c0_i32 = arith.constant 0 : i32
    %c0_i32_0 = arith.constant 0 : i32
    return %arg0, %c0_i32 : i32, i32
  }
}

module attributes {stable_mosaic.version = 11 : i64} {
  func.func @_convbn_add_relu_kernel(%arg0: i32, %arg1: memref<128x72xf32, #tpu.memory_space<vmem>>, %arg2: memref<72x128xf32, #tpu.memory_space<vmem>>, %arg3: memref<1x128xf32, #tpu.memory_space<vmem>>, %arg4: memref<128x128xf32, #tpu.memory_space<vmem>>, %arg5: memref<128x128xf32, #tpu.memory_space<vmem>>) attributes {dimension_semantics = [#tpu.dimension_semantics<parallel>], iteration_bounds = array<i64: 1>, scalar_prefetch = 0 : i64, scratch_operands = 0 : i64, tpu.core_type = #tpu.core_type<tc>, window_params = [{transform_indices = @transform_0, window_bounds = array<i64: 128, 72>}, {pipeline_mode = #tpu.pipeline_mode<synchronous>, transform_indices = @transform_1, window_bounds = array<i64: 72, 128>}, {pipeline_mode = #tpu.pipeline_mode<synchronous>, transform_indices = @transform_2, window_bounds = array<i64: 1, 128>}, {transform_indices = @transform_3, window_bounds = array<i64: 128, 128>}, {transform_indices = @transform_4, window_bounds = array<i64: 128, 128>}]} {
    %c0 = arith.constant 0 : index
    %c0_0 = arith.constant 0 : index
    %0 = vector.load %arg1[%c0, %c0_0] : memref<128x72xf32, #tpu.memory_space<vmem>>, vector<128x72xf32>
    %c0_1 = arith.constant 0 : index
    %c0_2 = arith.constant 0 : index
    %1 = vector.load %arg2[%c0_1, %c0_2] : memref<72x128xf32, #tpu.memory_space<vmem>>, vector<72x128xf32>
    %cst = arith.constant dense<0.000000e+00> : vector<128x128xf32>
    %2 = tpu.matmul %0, %1, %cst {dimension_numbers = #tpu.dot_dimension_numbers<[1], [0], [0], [1], [0, 0, 1, 1], [], []>} : vector<128x72xf32>, vector<72x128xf32>, vector<128x128xf32> -> vector<128x128xf32>
    %c0_3 = arith.constant 0 : index
    %c0_4 = arith.constant 0 : index
    %3 = vector.load %arg3[%c0_3, %c0_4] : memref<1x128xf32, #tpu.memory_space<vmem>>, vector<1x128xf32>
    %4 = vector.broadcast %3 : vector<1x128xf32> to vector<128x128xf32>
    %5 = arith.addf %2, %4 : vector<128x128xf32>
    %c0_5 = arith.constant 0 : index
    %c0_6 = arith.constant 0 : index
    %6 = vector.load %arg4[%c0_5, %c0_6] : memref<128x128xf32, #tpu.memory_space<vmem>>, vector<128x128xf32>
    %7 = arith.addf %5, %6 : vector<128x128xf32>
    %cst_7 = arith.constant 0.000000e+00 : f32
    %8 = vector.broadcast %cst_7 : f32 to vector<128x128xf32>
    %9 = arith.maximumf %7, %8 : vector<128x128xf32>
    %c0_8 = arith.constant 0 : index
    %c0_9 = arith.constant 0 : index
    %10 = vector.load %arg5[%c0_8, %c0_9] : memref<128x128xf32, #tpu.memory_space<vmem>>, vector<128x128xf32>
    tpu.vector_store %arg5[%c0_8, %c0_9], %9 {strides = array<i32>} : memref<128x128xf32, #tpu.memory_space<vmem>>, vector<128x128xf32>,
    return
  }
  func.func @transform_0(%arg0: i32) -> (i32, i32) {
    %c0_i32 = arith.constant 0 : i32
    %c0_i32_0 = arith.constant 0 : i32
    return %arg0, %c0_i32 : i32, i32
  }
  func.func @transform_1(%arg0: i32) -> (i32, i32) {
    %c0_i32 = arith.constant 0 : i32
    %c0_i32_0 = arith.constant 0 : i32
    %c0_i32_1 = arith.constant 0 : i32
    return %c0_i32, %c0_i32_0 : i32, i32
  }
  func.func @transform_2(%arg0: i32) -> (i32, i32) {
    %c0_i32 = arith.constant 0 : i32
    %c0_i32_0 = arith.constant 0 : i32
    %c0_i32_1 = arith.constant 0 : i32
    return %c0_i32, %c0_i32_0 : i32, i32
  }
  func.func @transform_3(%arg0: i32) -> (i32, i32) {
    %c0_i32 = arith.constant 0 : i32
    %c0_i32_0 = arith.constant 0 : i32
    return %arg0, %c0_i32 : i32, i32
  }
  func.func @transform_4(%arg0: i32) -> (i32, i32) {
    %c0_i32 = arith.constant 0 : i32
    %c0_i32_0 = arith.constant 0 : i32
    return %arg0, %c0_i32 : i32, i32
  }
}

</mosaic_0001>

<bundles_post_ra>
// kernel: basic_block_forward.4
= control target key start
LH: loop header
LB: loop body
LE: loop exit
PB: predicated region body
PF: predicated region fallthrough
CT: control target
= control target key end

     0   :  { %vm35_vm0 = vcmask 64512   ;;  %s327_s1 = inlined_call_operand.vmem [shape: f32[8,128], index: 1, kind: input, shape index: {}]   ;;  %s328_s0 = inlined_call_operand.vmem [shape: f32[128,8], index: 0, kind: input, shape index: {}]   ;;  %s329_s2 = inlined_call_operand.vmem [shape: f32[1,128], index: 2, kind: input, shape index: {}]   ;;  %s330_s3 = inlined_call_operand.vmem [shape: f32[128,128], index: 3, kind: output, shape index: {}]  }
   0x1   :  { %v30_v0 = vld [vmem:[%s327_s1] sm:$0xff]  ;;  %v23_v5 = vld [vmem:[%s328_s0 + $0x48] sm:$0xff]  ;;  %v24_v9 = vld [vmem:[%s328_s0 + $0x50] sm:$0xff] }
   0x2   :  { %v22_v1 = vld [vmem:[%s328_s0 + $0x40] sm:$0xff]  ;;  %186 = vmatpush.msra.mxu2 %v30_v0  ;;  %187 = vmatpush.msra.mxu3 %v30_v0  ;;  %v27_v6 = vld [vmem:[%s328_s0 + $0x68] sm:$0xff]  ;;  %v28_v10 = vld [vmem:[%s328_s0 + $0x70] sm:$0xff] }
   0x3   :  { %v26_v2 = vld [vmem:[%s328_s0 + $0x60] sm:$0xff]  ;;  %177 = vmatmul.msk.f32.vlgmr.msra.gmra.mxu2 %vm35_vm0, %v22_v1  ;;  %99 = vmatpush.msra.mxu0 %v30_v0  ;;  %v15_v7 = vld [vmem:[%s328_s0 + $0x8] sm:$0xff]  ;;  %v16_v11 = vld [vmem:[%s328_s0 + $0x10] sm:$0xff] }
   0x4   :  { %v14_v3 = vld [vmem:[%s328_s0] sm:$0xff]  ;;  %181 = vmatmul.msk.f32.vlgmr.msra.gmra.mxu3 %vm35_vm0, %v26_v2  ;;  %185 = vmatpush.msra.mxu1 %v30_v0  ;;  %v19_v8 = vld [vmem:[%s328_s0 + $0x28] sm:$0xff]  ;;  %v20_v12 = vld [vmem:[%s328_s0 + $0x30] sm:$0xff] }
   0x5   :  { %v18_v4 = vld [vmem:[%s328_s0 + $0x20] sm:$0xff]  ;;  %169 = vmatmul.msk.f32.vlgmr.msra.gmra.mxu0 %vm35_vm0, %v14_v3  ;;  %v25_v13 = vld [vmem:[%s328_s0 + $0x58] sm:$0xff] }
   0x6   :  { %173 = vmatmul.msk.f32.vlgmr.msra.gmra.mxu1 %vm35_vm0, %v18_v4  ;;  %v29_v14 = vld [vmem:[%s328_s0 + $0x78] sm:$0xff]  ;;  %v188_v17 = vld [vmem:[%s329_s2] ss:$0 sm:$0xff] }
   0x7   :  { %v17_v15 = vld [vmem:[%s328_s0 + $0x18] sm:$0xff] }
   0x8   :  { %v21_v16 = vld [vmem:[%s328_s0 + $0x38] sm:$0xff] }
   0xb   :  { %178 = vmatmul.msk.f32.gmra.mxu2 %vm35_vm0, %v23_v5 }
   0xc   :  { %182 = vmatmul.msk.f32.gmra.mxu3 %vm35_vm0, %v27_v6 }
   0xd   :  { %170 = vmatmul.msk.f32.gmra.mxu0 %vm35_vm0, %v15_v7 }
   0xe   :  { %174 = vmatmul.msk.f32.gmra.mxu1 %vm35_vm0, %v19_v8 }
  0x13   :  { %179 = vmatmul.msk.f32.gmra.mxu2 %vm35_vm0, %v24_v9 }
  0x14   :  { %183 = vmatmul.msk.f32.gmra.mxu3 %vm35_vm0, %v28_v10 }
  0x15   :  { %171 = vmatmul.msk.f32.gmra.mxu0 %vm35_vm0, %v16_v11 }
  0x16   :  { %175 = vmatmul.msk.f32.gmra.mxu1 %vm35_vm0, %v20_v12 }
  0x1b   :  { %180 = vmatmul.msk.f32.gmra.mxu2 %vm35_vm0, %v25_v13 }
  0x1c   :  { %184 = vmatmul.msk.f32.gmra.mxu3 %vm35_vm0, %v29_v14 }
  0x1d   :  { %172 = vmatmul.msk.f32.gmra.mxu0 %vm35_vm0, %v17_v15 }
  0x1e   :  { %176 = vmatmul.msk.f32.gmra.mxu1 %vm35_vm0, %v21_v16 }
  0x82   :  { %v101_v18 = vpop.f32.mrf.mxu0 }
  0x83   :  { %v113_v19 = vpop.f32.mrf.mxu1  ;;  %v102_v20 = vadd.f32 %v188_v17, %v101_v18 }
  0x84   :  { %v114_v21 = vadd.f32 %v188_v17, %v113_v19 }
  0x85   :  { %149 = vst [vmem:[%s330_s3] sm:$0xff] %v102_v20 }
  0x86   :  { %153 = vst [vmem:[%s330_s3 + $0x20] sm:$0xff] %v114_v21  ;;  %v125_v22 = vpop.f32.mrf.mxu2 }
  0x87   :  { %v137_v23 = vpop.f32.mrf.mxu3  ;;  %v126_v24 = vadd.f32 %v188_v17, %v125_v22 }
  0x88   :  { %v138_v25 = vadd.f32 %v188_v17, %v137_v23 }
  0x89   :  { %157 = vst [vmem:[%s330_s3 + $0x40] sm:$0xff] %v126_v24 }
  0x8a   :  { %161 = vst [vmem:[%s330_s3 + $0x60] sm:$0xff] %v138_v25  ;;  %v104_v26 = vpop.f32.mrf.mxu0 }
  0x8b   :  { %v116_v27 = vpop.f32.mrf.mxu1  ;;  %v105_v28 = vadd.f32 %v188_v17, %v104_v26 }
  0x8c   :  { %v117_v29 = vadd.f32 %v188_v17, %v116_v27 }
  0x8d   :  { %150 = vst [vmem:[%s330_s3 + $0x8] sm:$0xff] %v105_v28 }
  0x8e   :  { %154 = vst [vmem:[%s330_s3 + $0x28] sm:$0xff] %v117_v29  ;;  %v128_v30 = vpop.f32.mrf.mxu2 }
  0x8f   :  { %v140_v31 = vpop.f32.mrf.mxu3  ;;  %v129_v32 = vadd.f32 %v188_v17, %v128_v30 }
  0x90   :  { %v141_v33 = vadd.f32 %v188_v17, %v140_v31 }
  0x91   :  { %158 = vst [vmem:[%s330_s3 + $0x48] sm:$0xff] %v129_v32 }
  0x92   :  { %162 = vst [vmem:[%s330_s3 + $0x68] sm:$0xff] %v141_v33  ;;  %v107_v34 = vpop.f32.mrf.mxu0 }
  0x93   :  { %v119_v35 = vpop.f32.mrf.mxu1  ;;  %v108_v36 = vadd.f32 %v188_v17, %v107_v34 }
  0x94   :  { %v120_v37 = vadd.f32 %v188_v17, %v119_v35 }
  0x95   :  { %151 = vst [vmem:[%s330_s3 + $0x10] sm:$0xff] %v108_v36 }
  0x96   :  { %155 = vst [vmem:[%s330_s3 + $0x30] sm:$0xff] %v120_v37  ;;  %v131_v38 = vpop.f32.mrf.mxu2 }
  0x97   :  { %v143_v39 = vpop.f32.mrf.mxu3  ;;  %v132_v40 = vadd.f32 %v188_v17, %v131_v38 }
  0x98   :  { %v144_v41 = vadd.f32 %v188_v17, %v143_v39 }
  0x99   :  { %159 = vst [vmem:[%s330_s3 + $0x50] sm:$0xff] %v132_v40 }
  0x9a   :  { %163 = vst [vmem:[%s330_s3 + $0x70] sm:$0xff] %v144_v41  ;;  %v110_v42 = vpop.f32.mrf.mxu0 }
  0x9b   :  { %v122_v43 = vpop.f32.mrf.mxu1  ;;  %v111_v44 = vadd.f32 %v188_v17, %v110_v42 }
  0x9c   :  { %v123_v45 = vadd.f32 %v188_v17, %v122_v43 }
  0x9d   :  { %152 = vst [vmem:[%s330_s3 + $0x18] sm:$0xff] %v111_v44 }
  0x9e   :  { %156 = vst [vmem:[%s330_s3 + $0x38] sm:$0xff] %v123_v45  ;;  %v134_v46 = vpop.f32.mrf.mxu2 }
  0x9f   :  { %v146_v47 = vpop.f32.mrf.mxu3  ;;  %v135_v48 = vadd.f32 %v188_v17, %v134_v46 }
  0xa0   :  { %v147_v49 = vadd.f32 %v188_v17, %v146_v47 }
  0xa1   :  { %160 = vst [vmem:[%s330_s3 + $0x58] sm:$0xff] %v135_v48 }
  0xa2   :  { %164 = vst [vmem:[%s330_s3 + $0x78] sm:$0xff] %v147_v49 }

// kernel: basic_block_forward.3
= control target key start
LH: loop header
LB: loop body
LE: loop exit
PB: predicated region body
PF: predicated region fallthrough
CT: control target
= control target key end

     0   :  { %vm39_vm0 = vcmask 326656   ;;  %s371_s1 = inlined_call_operand.vmem [shape: f32[40,128], index: 1, kind: input, shape index: {}]   ;;  %s372_s0 = inlined_call_operand.vmem [shape: f32[128,40], index: 0, kind: input, shape index: {}]   ;;  %s373_s2 = inlined_call_operand.vmem [shape: f32[1,128], index: 2, kind: input, shape index: {}]   ;;  %s374_s3 = inlined_call_operand.vmem [shape: f32[128,128], index: 3, kind: output, shape index: {}]  }
   0x1   :  { %v34_v0 = vld [vmem:[%s371_s1 + $0x20] sm:$0xff]  ;;  %v33_v1 = vld [vmem:[%s371_s1 + $0x18] sm:$0xff]  ;;  %v32_v2 = vld [vmem:[%s371_s1 + $0x10] sm:$0xff] }
   0x2   :  { %206 = vmatpush.msra.mxu2 %v34_v0  ;;  %207 = vmatpush.msra.mxu3 %v34_v0  ;;  %v31_v3 = vld [vmem:[%s371_s1 + $0x8] sm:$0xff]  ;;  %v30_v4 = vld [vmem:[%s371_s1] sm:$0xff]  ;;  %v24_v13 = vld [vmem:[%s372_s0 + $0x50] sm:$0xff] }
   0x3   :  { %99 = vmatpush.msra.mxu0 %v34_v0  ;;  %205 = vmatpush.msra.mxu1 %v34_v0  ;;  %v22_v5 = vld [vmem:[%s372_s0 + $0x40] sm:$0xff]  ;;  %v23_v9 = vld [vmem:[%s372_s0 + $0x48] sm:$0xff]  ;;  %v28_v14 = vld [vmem:[%s372_s0 + $0x70] sm:$0xff] }
   0x4   :  { %209 = vmatpush.msra.mxu2 %v33_v1  ;;  %210 = vmatpush.msra.mxu3 %v33_v1  ;;  %v26_v6 = vld [vmem:[%s372_s0 + $0x60] sm:$0xff]  ;;  %v27_v10 = vld [vmem:[%s372_s0 + $0x68] sm:$0xff]  ;;  %v16_v15 = vld [vmem:[%s372_s0 + $0x10] sm:$0xff] }
   0x5   :  { %100 = vmatpush.msra.mxu0 %v33_v1  ;;  %208 = vmatpush.msra.mxu1 %v33_v1  ;;  %v14_v7 = vld [vmem:[%s372_s0] sm:$0xff]  ;;  %v15_v11 = vld [vmem:[%s372_s0 + $0x8] sm:$0xff]  ;;  %v20_v16 = vld [vmem:[%s372_s0 + $0x30] sm:$0xff] }
   0x6   :  { %212 = vmatpush.msra.mxu2 %v32_v2  ;;  %213 = vmatpush.msra.mxu3 %v32_v2  ;;  %v18_v8 = vld [vmem:[%s372_s0 + $0x20] sm:$0xff]  ;;  %v19_v12 = vld [vmem:[%s372_s0 + $0x28] sm:$0xff]  ;;  %v25_v17 = vld [vmem:[%s372_s0 + $0x58] sm:$0xff] }
   0x7   :  { %101 = vmatpush.msra.mxu0 %v32_v2  ;;  %211 = vmatpush.msra.mxu1 %v32_v2  ;;  %v29_v18 = vld [vmem:[%s372_s0 + $0x78] sm:$0xff]  ;;  %v220_v21 = vld [vmem:[%s373_s2] ss:$0 sm:$0xff] }
   0x8   :  { %215 = vmatpush.msra.mxu2 %v31_v3  ;;  %216 = vmatpush.msra.mxu3 %v31_v3  ;;  %v17_v19 = vld [vmem:[%s372_s0 + $0x18] sm:$0xff] }
   0x9   :  { %102 = vmatpush.msra.mxu0 %v31_v3  ;;  %214 = vmatpush.msra.mxu1 %v31_v3  ;;  %v21_v20 = vld [vmem:[%s372_s0 + $0x38] sm:$0xff] }
   0xa   :  { %218 = vmatpush.msra.mxu2 %v30_v4  ;;  %219 = vmatpush.msra.mxu3 %v30_v4 }
   0xb   :  { %197 = vmatmul.msk.f32.vlgmr.msra.gmra.mxu2 %vm39_vm0, %v22_v5  ;;  %201 = vmatmul.msk.f32.vlgmr.msra.gmra.mxu3 %vm39_vm0, %v26_v6 }
   0xc   :  { %103 = vmatpush.msra.mxu0 %v30_v4  ;;  %217 = vmatpush.msra.mxu1 %v30_v4 }
   0xd   :  { %189 = vmatmul.msk.f32.vlgmr.msra.gmra.mxu0 %vm39_vm0, %v14_v7  ;;  %193 = vmatmul.msk.f32.vlgmr.msra.gmra.mxu1 %vm39_vm0, %v18_v8 }
  0x13   :  { %198 = vmatmul.msk.f32.gmra.mxu2 %vm39_vm0, %v23_v9  ;;  %202 = vmatmul.msk.f32.gmra.mxu3 %vm39_vm0, %v27_v10 }
  0x15   :  { %190 = vmatmul.msk.f32.gmra.mxu0 %vm39_vm0, %v15_v11  ;;  %194 = vmatmul.msk.f32.gmra.mxu1 %vm39_vm0, %v19_v12 }
  0x1b   :  { %199 = vmatmul.msk.f32.gmra.mxu2 %vm39_vm0, %v24_v13  ;;  %203 = vmatmul.msk.f32.gmra.mxu3 %vm39_vm0, %v28_v14 }
  0x1d   :  { %191 = vmatmul.msk.f32.gmra.mxu0 %vm39_vm0, %v16_v15  ;;  %195 = vmatmul.msk.f32.gmra.mxu1 %vm39_vm0, %v20_v16 }
  0x23   :  { %200 = vmatmul.msk.f32.gmra.mxu2 %vm39_vm0, %v25_v17  ;;  %204 = vmatmul.msk.f32.gmra.mxu3 %vm39_vm0, %v29_v18 }
  0x25   :  { %192 = vmatmul.msk.f32.gmra.mxu0 %vm39_vm0, %v17_v19  ;;  %196 = vmatmul.msk.f32.gmra.mxu1 %vm39_vm0, %v21_v20 }
  0x8a   :  { %v105_v22 = vpop.f32.mrf.mxu0  ;;  %v117_v23 = vpop.f32.mrf.mxu1 }
  0x8b   :  { %v106_v24 = vadd.f32 %v220_v21, %v105_v22  ;;  %v118_v25 = vadd.f32 %v220_v21, %v117_v23 }
  0x8d   :  { %v153_v26 = vmax.f32 %v106_v24, 0.0  ;;  %v157_v27 = vmax.f32 %v118_v25, 0.0 }
  0x8e   :  { %v129_v28 = vpop.f32.mrf.mxu2  ;;  %v141_v29 = vpop.f32.mrf.mxu3 }
  0x8f   :  { %169 = vst [vmem:[%s374_s3] sm:$0xff] %v153_v26  ;;  %v130_v30 = vadd.f32 %v220_v21, %v129_v28  ;;  %v142_v31 = vadd.f32 %v220_v21, %v141_v29 }
  0x90   :  { %173 = vst [vmem:[%s374_s3 + $0x20] sm:$0xff] %v157_v27 }
  0x91   :  { %v161_v32 = vmax.f32 %v130_v30, 0.0  ;;  %v165_v33 = vmax.f32 %v142_v31, 0.0 }
  0x92   :  { %v108_v34 = vpop.f32.mrf.mxu0  ;;  %v120_v35 = vpop.f32.mrf.mxu1 }
  0x93   :  { %177 = vst [vmem:[%s374_s3 + $0x40] sm:$0xff] %v161_v32  ;;  %v109_v36 = vadd.f32 %v220_v21, %v108_v34  ;;  %v121_v37 = vadd.f32 %v220_v21, %v120_v35 }
  0x94   :  { %181 = vst [vmem:[%s374_s3 + $0x60] sm:$0xff] %v165_v33 }
  0x95   :  { %v154_v38 = vmax.f32 %v109_v36, 0.0  ;;  %v158_v39 = vmax.f32 %v121_v37, 0.0 }
  0x96   :  { %v132_v40 = vpop.f32.mrf.mxu2  ;;  %v144_v41 = vpop.f32.mrf.mxu3 }
  0x97   :  { %170 = vst [vmem:[%s374_s3 + $0x8] sm:$0xff] %v154_v38  ;;  %v133_v42 = vadd.f32 %v220_v21, %v132_v40  ;;  %v145_v43 = vadd.f32 %v220_v21, %v144_v41 }
  0x98   :  { %174 = vst [vmem:[%s374_s3 + $0x28] sm:$0xff] %v158_v39 }
  0x99   :  { %v162_v44 = vmax.f32 %v133_v42, 0.0  ;;  %v166_v45 = vmax.f32 %v145_v43, 0.0 }
  0x9a   :  { %v111_v46 = vpop.f32.mrf.mxu0  ;;  %v123_v47 = vpop.f32.mrf.mxu1 }
  0x9b   :  { %178 = vst [vmem:[%s374_s3 + $0x48] sm:$0xff] %v162_v44  ;;  %v112_v48 = vadd.f32 %v220_v21, %v111_v46  ;;  %v124_v49 = vadd.f32 %v220_v21, %v123_v47 }
  0x9c   :  { %182 = vst [vmem:[%s374_s3 + $0x68] sm:$0xff] %v166_v45 }
  0x9d   :  { %v155_v50 = vmax.f32 %v112_v48, 0.0  ;;  %v159_v51 = vmax.f32 %v124_v49, 0.0 }
  0x9e   :  { %v135_v52 = vpop.f32.mrf.mxu2  ;;  %v147_v53 = vpop.f32.mrf.mxu3 }
  0x9f   :  { %171 = vst [vmem:[%s374_s3 + $0x10] sm:$0xff] %v155_v50  ;;  %v136_v54 = vadd.f32 %v220_v21, %v135_v52  ;;  %v148_v55 = vadd.f32 %v220_v21, %v147_v53 }
  0xa0   :  { %175 = vst [vmem:[%s374_s3 + $0x30] sm:$0xff] %v159_v51 }
  0xa1   :  { %v163_v56 = vmax.f32 %v136_v54, 0.0  ;;  %v167_v57 = vmax.f32 %v148_v55, 0.0 }
  0xa2   :  { %v114_v58 = vpop.f32.mrf.mxu0  ;;  %v126_v59 = vpop.f32.mrf.mxu1 }
  0xa3   :  { %179 = vst [vmem:[%s374_s3 + $0x50] sm:$0xff] %v163_v56  ;;  %v115_v60 = vadd.f32 %v220_v21, %v114_v58  ;;  %v127_v61 = vadd.f32 %v220_v21, %v126_v59 }
  0xa4   :  { %183 = vst [vmem:[%s374_s3 + $0x70] sm:$0xff] %v167_v57 }
  0xa5   :  { %v156_v62 = vmax.f32 %v115_v60, 0.0  ;;  %v160_v63 = vmax.f32 %v127_v61, 0.0 }
  0xa6   :  { %v138_v0 = vpop.f32.mrf.mxu2  ;;  %v150_v1 = vpop.f32.mrf.mxu3 }
  0xa7   :  { %172 = vst [vmem:[%s374_s3 + $0x18] sm:$0xff] %v156_v62  ;;  %v139_v2 = vadd.f32 %v220_v21, %v138_v0  ;;  %v151_v3 = vadd.f32 %v220_v21, %v150_v1 }
  0xa8   :  { %176 = vst [vmem:[%s374_s3 + $0x38] sm:$0xff] %v160_v63 }
  0xa9   :  { %v164_v4 = vmax.f32 %v139_v2, 0.0  ;;  %v168_v5 = vmax.f32 %v151_v3, 0.0 }
  0xab   :  { %180 = vst [vmem:[%s374_s3 + $0x58] sm:$0xff] %v164_v4 }
  0xac   :  { %184 = vst [vmem:[%s374_s3 + $0x78] sm:$0xff] %v168_v5 }

// kernel: basic_block_forward.5
= control target key start
LH: loop header
LB: loop body
LE: loop exit
PB: predicated region body
PF: predicated region fallthrough
CT: control target
= control target key end

     0   :  { %vm46_vm0 = vcmask 588800   ;;  %s505_s1 = inlined_call_operand.vmem [shape: f32[72,128], index: 1, kind: input, shape index: {}]   ;;  %s506_s2 = inlined_call_operand.vmem [shape: f32[1,128], index: 2, kind: input, shape index: {}]   ;;  %s507_s0 = inlined_call_operand.vmem [shape: f32[128,72], index: 0, kind: input, shape index: {}]   ;;  %s508_s3 = inlined_call_operand.vmem [shape: f32[128,128], index: 3, kind: input, shape index: {}]   ;;  %s509_s4 = inlined_call_operand.vmem [shape: f32[128,128], index: 4, kind: output, shape index: {}]  }
   0x1   :  { %v41_v0 = vld [vmem:[%s505_s1 + $0x40] sm:$0xff]  ;;  %v40_v1 = vld [vmem:[%s505_s1 + $0x38] sm:$0xff]  ;;  %v39_v2 = vld [vmem:[%s505_s1 + $0x30] sm:$0xff] }
   0x2   :  { %245 = vmatpush.msra.mxu2 %v41_v0  ;;  %246 = vmatpush.msra.mxu3 %v41_v0  ;;  %v38_v3 = vld [vmem:[%s505_s1 + $0x28] sm:$0xff]  ;;  %v37_v4 = vld [vmem:[%s505_s1 + $0x20] sm:$0xff]  ;;  %v36_v5 = vld [vmem:[%s505_s1 + $0x18] sm:$0xff] }
   0x3   :  { %102 = vmatpush.msra.mxu0 %v41_v0  ;;  %244 = vmatpush.msra.mxu1 %v41_v0  ;;  %v35_v6 = vld [vmem:[%s505_s1 + $0x10] sm:$0xff]  ;;  %v34_v7 = vld [vmem:[%s505_s1 + $0x8] sm:$0xff]  ;;  %v33_v8 = vld [vmem:[%s505_s1] sm:$0xff] }
   0x4   :  { %248 = vmatpush.msra.mxu2 %v40_v1  ;;  %249 = vmatpush.msra.mxu3 %v40_v1  ;;  %v25_v9 = vld [vmem:[%s507_s0 + $0x40] sm:$0xff]  ;;  %v26_v13 = vld [vmem:[%s507_s0 + $0x48] sm:$0xff]  ;;  %v27_v17 = vld [vmem:[%s507_s0 + $0x50] sm:$0xff] }
   0x5   :  { %103 = vmatpush.msra.mxu0 %v40_v1  ;;  %247 = vmatpush.msra.mxu1 %v40_v1  ;;  %v29_v10 = vld [vmem:[%s507_s0 + $0x60] sm:$0xff]  ;;  %v30_v14 = vld [vmem:[%s507_s0 + $0x68] sm:$0xff]  ;;  %v31_v18 = vld [vmem:[%s507_s0 + $0x70] sm:$0xff] }
   0x6   :  { %251 = vmatpush.msra.mxu2 %v39_v2  ;;  %252 = vmatpush.msra.mxu3 %v39_v2  ;;  %v17_v11 = vld [vmem:[%s507_s0] sm:$0xff]  ;;  %v18_v15 = vld [vmem:[%s507_s0 + $0x8] sm:$0xff]  ;;  %v19_v19 = vld [vmem:[%s507_s0 + $0x10] sm:$0xff] }
   0x7   :  { %104 = vmatpush.msra.mxu0 %v39_v2  ;;  %250 = vmatpush.msra.mxu1 %v39_v2  ;;  %v21_v12 = vld [vmem:[%s507_s0 + $0x20] sm:$0xff]  ;;  %v22_v16 = vld [vmem:[%s507_s0 + $0x28] sm:$0xff]  ;;  %v23_v20 = vld [vmem:[%s507_s0 + $0x30] sm:$0xff] }
   0x8   :  { %254 = vmatpush.msra.mxu2 %v38_v3  ;;  %255 = vmatpush.msra.mxu3 %v38_v3  ;;  %v28_v21 = vld [vmem:[%s507_s0 + $0x58] sm:$0xff]  ;;  %v391_v25 = vld [vmem:[%s506_s2] ss:$0 sm:$0xff]  ;;  %v161_v45 = vld [vmem:[%s508_s3 + $0x8] sm:$0xff] }
   0x9   :  { %105 = vmatpush.msra.mxu0 %v38_v3  ;;  %253 = vmatpush.msra.mxu1 %v38_v3  ;;  %v32_v22 = vld [vmem:[%s507_s0 + $0x78] sm:$0xff]  ;;  %v160_v27 = vld [vmem:[%s508_s3] sm:$0xff]  ;;  %v165_v47 = vld [vmem:[%s508_s3 + $0x28] sm:$0xff] }
   0xa   :  { %257 = vmatpush.msra.mxu2 %v37_v4  ;;  %258 = vmatpush.msra.mxu3 %v37_v4  ;;  %v20_v23 = vld [vmem:[%s507_s0 + $0x18] sm:$0xff]  ;;  %v164_v29 = vld [vmem:[%s508_s3 + $0x20] sm:$0xff]  ;;  %v169_v55 = vld [vmem:[%s508_s3 + $0x48] sm:$0xff] }
   0xb   :  { %106 = vmatpush.msra.mxu0 %v37_v4  ;;  %256 = vmatpush.msra.mxu1 %v37_v4  ;;  %v24_v24 = vld [vmem:[%s507_s0 + $0x38] sm:$0xff]  ;;  %v168_v35 = vld [vmem:[%s508_s3 + $0x40] sm:$0xff]  ;;  %v173_v57 = vld [vmem:[%s508_s3 + $0x68] sm:$0xff] }
   0xc   :  { %260 = vmatpush.msra.mxu2 %v36_v5  ;;  %261 = vmatpush.msra.mxu3 %v36_v5  ;;  %v172_v37 = vld [vmem:[%s508_s3 + $0x60] sm:$0xff]  ;;  %v162_v1 = vld [vmem:[%s508_s3 + $0x10] sm:$0xff] }
   0xd   :  { %107 = vmatpush.msra.mxu0 %v36_v5  ;;  %259 = vmatpush.msra.mxu1 %v36_v5  ;;  %v166_v3 = vld [vmem:[%s508_s3 + $0x30] sm:$0xff] }
   0xe   :  { %263 = vmatpush.msra.mxu2 %v35_v6  ;;  %264 = vmatpush.msra.mxu3 %v35_v6 }
   0xf   :  { %108 = vmatpush.msra.mxu0 %v35_v6  ;;  %262 = vmatpush.msra.mxu1 %v35_v6 }
  0x10   :  { %266 = vmatpush.msra.mxu2 %v34_v7  ;;  %267 = vmatpush.msra.mxu3 %v34_v7 }
  0x11   :  { %109 = vmatpush.msra.mxu0 %v34_v7  ;;  %265 = vmatpush.msra.mxu1 %v34_v7 }
  0x12   :  { %269 = vmatpush.msra.mxu2 %v33_v8  ;;  %270 = vmatpush.msra.mxu3 %v33_v8 }
  0x13   :  { %236 = vmatmul.msk.f32.vlgmr.msra.gmra.mxu2 %vm46_vm0, %v25_v9  ;;  %240 = vmatmul.msk.f32.vlgmr.msra.gmra.mxu3 %vm46_vm0, %v29_v10 }
  0x14   :  { %110 = vmatpush.msra.mxu0 %v33_v8  ;;  %268 = vmatpush.msra.mxu1 %v33_v8 }
  0x15   :  { %228 = vmatmul.msk.f32.vlgmr.msra.gmra.mxu0 %vm46_vm0, %v17_v11  ;;  %232 = vmatmul.msk.f32.vlgmr.msra.gmra.mxu1 %vm46_vm0, %v21_v12  ;;  %v170_v11 = vld [vmem:[%s508_s3 + $0x50] sm:$0xff] }
  0x1b   :  { %237 = vmatmul.msk.f32.gmra.mxu2 %vm46_vm0, %v26_v13  ;;  %241 = vmatmul.msk.f32.gmra.mxu3 %vm46_vm0, %v30_v14  ;;  %v174_v13 = vld [vmem:[%s508_s3 + $0x70] sm:$0xff] }
  0x1d   :  { %229 = vmatmul.msk.f32.gmra.mxu0 %vm46_vm0, %v18_v15  ;;  %233 = vmatmul.msk.f32.gmra.mxu1 %vm46_vm0, %v22_v16 }
  0x23   :  { %238 = vmatmul.msk.f32.gmra.mxu2 %vm46_vm0, %v27_v17  ;;  %242 = vmatmul.msk.f32.gmra.mxu3 %vm46_vm0, %v31_v18 }
  0x25   :  { %230 = vmatmul.msk.f32.gmra.mxu0 %vm46_vm0, %v19_v19  ;;  %234 = vmatmul.msk.f32.gmra.mxu1 %vm46_vm0, %v23_v20 }
  0x2b   :  { %239 = vmatmul.msk.f32.gmra.mxu2 %vm46_vm0, %v28_v21  ;;  %243 = vmatmul.msk.f32.gmra.mxu3 %vm46_vm0, %v32_v22  ;;  %v163_v21 = vld [vmem:[%s508_s3 + $0x18] sm:$0xff] }
  0x2d   :  { %231 = vmatmul.msk.f32.gmra.mxu0 %vm46_vm0, %v20_v23  ;;  %235 = vmatmul.msk.f32.gmra.mxu1 %vm46_vm0, %v24_v24  ;;  %v167_v23 = vld [vmem:[%s508_s3 + $0x38] sm:$0xff] }
  0x92   :  { %v112_v26 = vpop.f32.mrf.mxu0  ;;  %v124_v28 = vpop.f32.mrf.mxu1 }
  0x93   :  { %v113_v30 = vadd.f32 %v391_v25, %v112_v26  ;;  %v125_v31 = vadd.f32 %v391_v25, %v124_v28 }
  0x95   :  { %v176_v32 = vadd.f32 %v160_v27, %v113_v30  ;;  %v180_v33 = vadd.f32 %v164_v29, %v125_v31 }
  0x96   :  { %v136_v34 = vpop.f32.mrf.mxu2  ;;  %v148_v36 = vpop.f32.mrf.mxu3 }
  0x97   :  { %v192_v38 = vmax.f32 %v176_v32, 0.0  ;;  %v196_v39 = vmax.f32 %v180_v33, 0.0  ;;  %v137_v40 = vadd.f32 %v391_v25, %v136_v34  ;;  %v149_v41 = vadd.f32 %v391_v25, %v148_v36  ;;  %v171_v32 = vld [vmem:[%s508_s3 + $0x58] sm:$0xff] }
  0x98   :  { %v175_v34 = vld [vmem:[%s508_s3 + $0x78] sm:$0xff] }
  0x99   :  { %208 = vst [vmem:[%s509_s4] sm:$0xff] %v192_v38  ;;  %v184_v42 = vadd.f32 %v168_v35, %v137_v40  ;;  %v188_v43 = vadd.f32 %v172_v37, %v149_v41 }
  0x9a   :  { %212 = vst [vmem:[%s509_s4 + $0x20] sm:$0xff] %v196_v39  ;;  %v115_v44 = vpop.f32.mrf.mxu0  ;;  %v127_v46 = vpop.f32.mrf.mxu1 }
  0x9b   :  { %v200_v48 = vmax.f32 %v184_v42, 0.0  ;;  %v204_v49 = vmax.f32 %v188_v43, 0.0  ;;  %v116_v50 = vadd.f32 %v391_v25, %v115_v44  ;;  %v128_v51 = vadd.f32 %v391_v25, %v127_v46 }
  0x9d   :  { %216 = vst [vmem:[%s509_s4 + $0x40] sm:$0xff] %v200_v48  ;;  %v177_v52 = vadd.f32 %v161_v45, %v116_v50  ;;  %v181_v53 = vadd.f32 %v165_v47, %v128_v51 }
  0x9e   :  { %220 = vst [vmem:[%s509_s4 + $0x60] sm:$0xff] %v204_v49  ;;  %v139_v54 = vpop.f32.mrf.mxu2  ;;  %v151_v56 = vpop.f32.mrf.mxu3 }
  0x9f   :  { %v193_v58 = vmax.f32 %v177_v52, 0.0  ;;  %v197_v59 = vmax.f32 %v181_v53, 0.0  ;;  %v140_v60 = vadd.f32 %v391_v25, %v139_v54  ;;  %v152_v61 = vadd.f32 %v391_v25, %v151_v56 }
  0xa1   :  { %209 = vst [vmem:[%s509_s4 + $0x8] sm:$0xff] %v193_v58  ;;  %v185_v62 = vadd.f32 %v169_v55, %v140_v60  ;;  %v189_v63 = vadd.f32 %v173_v57, %v152_v61 }
  0xa2   :  { %213 = vst [vmem:[%s509_s4 + $0x28] sm:$0xff] %v197_v59  ;;  %v118_v0 = vpop.f32.mrf.mxu0  ;;  %v130_v2 = vpop.f32.mrf.mxu1 }
  0xa3   :  { %v201_v4 = vmax.f32 %v185_v62, 0.0  ;;  %v205_v5 = vmax.f32 %v189_v63, 0.0  ;;  %v119_v6 = vadd.f32 %v391_v25, %v118_v0  ;;  %v131_v7 = vadd.f32 %v391_v25, %v130_v2 }
  0xa5   :  { %217 = vst [vmem:[%s509_s4 + $0x48] sm:$0xff] %v201_v4  ;;  %v178_v8 = vadd.f32 %v162_v1, %v119_v6  ;;  %v182_v9 = vadd.f32 %v166_v3, %v131_v7 }
  0xa6   :  { %221 = vst [vmem:[%s509_s4 + $0x68] sm:$0xff] %v205_v5  ;;  %v142_v10 = vpop.f32.mrf.mxu2  ;;  %v154_v12 = vpop.f32.mrf.mxu3 }
  0xa7   :  { %v194_v14 = vmax.f32 %v178_v8, 0.0  ;;  %v198_v15 = vmax.f32 %v182_v9, 0.0  ;;  %v143_v16 = vadd.f32 %v391_v25, %v142_v10  ;;  %v155_v17 = vadd.f32 %v391_v25, %v154_v12 }
  0xa9   :  { %210 = vst [vmem:[%s509_s4 + $0x10] sm:$0xff] %v194_v14  ;;  %v186_v18 = vadd.f32 %v170_v11, %v143_v16  ;;  %v190_v19 = vadd.f32 %v174_v13, %v155_v17 }
  0xaa   :  { %214 = vst [vmem:[%s509_s4 + $0x30] sm:$0xff] %v198_v15  ;;  %v121_v20 = vpop.f32.mrf.mxu0  ;;  %v133_v22 = vpop.f32.mrf.mxu1 }
  0xab   :  { %v202_v24 = vmax.f32 %v186_v18, 0.0  ;;  %v206_v26 = vmax.f32 %v190_v19, 0.0  ;;  %v122_v27 = vadd.f32 %v391_v25, %v121_v20  ;;  %v134_v28 = vadd.f32 %v391_v25, %v133_v22 }
  0xad   :  { %218 = vst [vmem:[%s509_s4 + $0x50] sm:$0xff] %v202_v24  ;;  %v179_v29 = vadd.f32 %v163_v21, %v122_v27  ;;  %v183_v30 = vadd.f32 %v167_v23, %v134_v28 }
  0xae   :  { %222 = vst [vmem:[%s509_s4 + $0x70] sm:$0xff] %v206_v26  ;;  %v145_v31 = vpop.f32.mrf.mxu2  ;;  %v157_v33 = vpop.f32.mrf.mxu3 }
  0xaf   :  { %v195_v35 = vmax.f32 %v179_v29, 0.0  ;;  %v199_v36 = vmax.f32 %v183_v30, 0.0  ;;  %v146_v37 = vadd.f32 %v391_v25, %v145_v31  ;;  %v158_v38 = vadd.f32 %v391_v25, %v157_v33 }
  0xb1   :  { %211 = vst [vmem:[%s509_s4 + $0x18] sm:$0xff] %v195_v35  ;;  %v187_v39 = vadd.f32 %v171_v32, %v146_v37  ;;  %v191_v40 = vadd.f32 %v175_v34, %v158_v38 }
  0xb2   :  { %215 = vst [vmem:[%s509_s4 + $0x38] sm:$0xff] %v199_v36 }
  0xb3   :  { %v203_v41 = vmax.f32 %v187_v39, 0.0  ;;  %v207_v42 = vmax.f32 %v191_v40, 0.0 }
  0xb5   :  { %219 = vst [vmem:[%s509_s4 + $0x58] sm:$0xff] %v203_v41 }
  0xb6   :  { %223 = vst [vmem:[%s509_s4 + $0x78] sm:$0xff] %v207_v42 }

</bundles_post_ra>
